<compile_context>
chip_gen: v6e
topology: v6e:2x2x1
jax: 0.10.0
libtpu: 0.0.40
codegen_flags: <defaults>
</compile_context>

<pallas_src>
import functools

import jax
import jax.numpy as jnp
from jax.experimental import pallas as pl
from jax.experimental.pallas import tpu as pltpu

_NEG = -3.0e38  # finite "minus infinity": keeps alpha/exp NaN-free when a tile is fully masked


def generate_2dgrid(h, w, centered=False):
    """JAX port of habitat_baselines' generate_2dgrid. Returns (1, 2, h, w)."""
    if centered:
        xs = jnp.linspace(-w / 2 + 1, w / 2, w, dtype=jnp.float32)
        ys = jnp.linspace(-h / 2 + 1, h / 2, h, dtype=jnp.float32)
    else:
        xs = jnp.linspace(0.0, w - 1, w, dtype=jnp.float32)
        ys = jnp.linspace(0.0, h - 1, h, dtype=jnp.float32)
    yy = jnp.tile(ys[:, None], (1, w))          # (h, w)  row index
    xx = jnp.tile(xs[None, :], (h, 1))          # (h, w)  col index
    return jnp.stack([yy, xx], axis=0)[None]    # (1, 2, h, w)


def _softargmin_kernel(x_ref, o_ref, m_sc, acc_sc, *, beta, h, tile_rows,
                       tiles_per_core):
    """One row-tile of the online soft-argmin reduction (per-core partials).

    x_ref  : (tile_rows, W) tile of the cost map (any float dtype).
    o_ref  : (1, 1, 128) per-core partial; lane 0 = running max m,
             lane 1 = sum(e), lane 2 = sum(e*row), lane 3 = sum(e*col).
    m_sc   : (1, 1)   f32 running max.
    acc_sc : (1, 128) f32 lane-packed running sums (lanes 1..3 = s, ny, nx).
    """
    c = pl.program_id(0)          # TensorCore split ("parallel")
    i = pl.program_id(1)          # row-tile index within this core ("arbitrary")

    @pl.when(i == 0)
    def _init():
        m_sc[...] = jnp.full((1, 1), _NEG, jnp.float32)
        acc_sc[...] = jnp.zeros((1, 128), jnp.float32)

    th, w = x_ref.shape
    glob_tile = c * tiles_per_core + i            # logical tile id (may exceed last real tile)
    row_off = glob_tile * tile_rows

    x = x_ref[...].astype(jnp.float32)            # in-kernel upcast (bf16 inputs OK)
    z = (-beta) * x                               # beta * (-x)

    # Row validity for cdiv-tail / phantom tiles (tiny (th,1) vectors only).
    rows = jax.lax.broadcasted_iota(jnp.int32, (th, 1), 0) + row_off
    valid = rows < h                              # (th, 1)
    rows_f = rows.astype(jnp.float32)

    # Masked tile max via a cheap (th,1) row-max select (no full-tile select).
    row_max = jnp.where(valid, jnp.max(z, axis=1, keepdims=True), _NEG)
    m_old = m_sc[...]                             # (1, 1)
    m_new = jnp.maximum(m_old, jnp.max(row_max))  # (1, 1), always finite
    alpha = jnp.exp(m_old - m_new)                # (1, 1) in [0, 1]

    # Full-tile work: one mul, one sub, one select + EUP exp per element.
    e = jnp.where(valid, jnp.exp(z - m_new), 0.0)          # (th, w)

    # Marginal sums instead of coordinate planes.
    r = jnp.sum(e, axis=1, keepdims=True)                   # (th, 1)
    col = jnp.sum(e, axis=0, keepdims=True)                 # (1, w)
    cols_f = jax.lax.broadcasted_iota(jnp.int32, (1, w), 1).astype(jnp.float32)

    s_part = jnp.sum(r)
    ny_part = jnp.sum(r * rows_f)
    nx_part = jnp.sum(col * cols_f)

    # Single lane-packed accumulator update per tile.
    lane = jax.lax.broadcasted_iota(jnp.int32, (1, 128), 1)
    partials = (jnp.where(lane == 1, s_part, 0.0)
                + jnp.where(lane == 2, ny_part, 0.0)
                + jnp.where(lane == 3, nx_part, 0.0))
    acc_sc[...] = alpha * acc_sc[...] + partials
    m_sc[...] = m_new

    @pl.when(i == pl.num_programs(1) - 1)
    def _finalize():
        out = jnp.where(lane == 0, m_sc[...], acc_sc[...])   # (1, 128)
        o_ref[...] = out[None]                                # (1, 1, 128)


def _choose_tile_rows(h, w, itemsize, tile_bytes):
    """Dtype-aware row-tile size.

    Granularity is the dtype's min sublane count (8 f32 / 16 bf16 / 32 int8)
    so DMA and vector loads stay packed-dense.  Large maps get the biggest
    granular tile under `tile_bytes`; medium maps are split in two so both
    v7x TensorCores get work; tiny maps use one full-height block (full-dim
    blocks are exempt from the sublane rule).
    """
    min_rows = max(8, 32 // max(itemsize, 1))
    row_bytes = max(w * itemsize, 1)
    max_rows = max((tile_bytes // row_bytes) // min_rows * min_rows, min_rows)
    if h > max_rows:
        return max_rows
    if h >= 2 * min_rows:
        half = -(-h // 2)
        return -(-half // min_rows) * min_rows
    return h


def soft_arg_min(x, beta=5, coords2d=None, tile_rows=None, tile_bytes=8 << 20):
    """x: NCHW array of shape (1, 1, H, W). Returns (2,) = (y, x) soft argmin."""
    if coords2d is not None:
        # TODO(synk): custom coords2d grids are not lowered to Pallas (the default
        # grid is synthesized in-kernel); this rare path runs in plain JAX.
        bx_sm = jax.nn.softmax(
            float(beta) * (-x).reshape(1, -1).astype(jnp.float32), axis=1)
        cf = coords2d.reshape(2, -1).astype(jnp.float32)
        return (bx_sm * cf).sum(axis=1) / bx_sm.sum(axis=1)

    assert x.shape[0] == 1 and x.shape[1] == 1, "SoftArgMin expects a (1, 1, H, W) cost map"
    h, w = int(x.shape[2]), int(x.shape[3])
    x2d = x.reshape(h, w)                         # sublane-dense slab, dtype preserved

    itemsize = x2d.dtype.itemsize
    min_rows = max(8, 32 // max(itemsize, 1))
    if tile_rows is None:
        tile_rows = _choose_tile_rows(h, w, itemsize, tile_bytes)
    assert tile_rows == h or tile_rows % min_rows == 0, (
        f"tile_rows={tile_rows} must equal H or be a multiple of {min_rows}")

    total_tiles = -(-h // tile_rows)              # cdiv(h, tile_rows)
    tiles_per_core = -(-total_tiles // 2)         # split row-tiles across 2 TCs
    last_tile = total_tiles - 1

    tile_bytes_actual = tile_rows * w * itemsize
    vmem_limit = int(min(60 << 20, max(8 << 20, 2 * tile_bytes_actual + (2 << 20))))

    parts = pl.pallas_call(
        functools.partial(_softargmin_kernel, beta=float(beta), h=h,
                          tile_rows=tile_rows, tiles_per_core=tiles_per_core),
        out_shape=jax.ShapeDtypeStruct((2, 1, 128), jnp.float32),
        grid=(2, tiles_per_core),
        in_specs=[pl.BlockSpec(
            (tile_rows, w),
            # Clamp phantom tiles (fully past H) onto the last real block; the
            # kernel masks them out via the *logical* tile index.
            lambda c, i: (jnp.minimum(c * tiles_per_core + i, last_tile), 0))],
        out_specs=pl.BlockSpec((1, 1, 128), lambda c, i: (c, 0, 0)),
        scratch_shapes=[pltpu.VMEM((1, 1), jnp.float32),     # running max
                        pltpu.VMEM((1, 128), jnp.float32)],  # lane-packed s/ny/nx
        compiler_params=pltpu.CompilerParams(
            dimension_semantics=("parallel", "arbitrary"),
            vmem_limit_bytes=vmem_limit),
    )(x2d)

    # Merge the two per-core partials (max-rescale combine) in plain JAX.
    parts = parts[:, 0, :]                        # (2, 128)
    m = parts[:, 0]
    s = parts[:, 1]
    ny = parts[:, 2]
    nx = parts[:, 3]
    m_glob = jnp.max(m)
    wgt = jnp.exp(m - m_glob)                     # phantom core: exp(-3e38 - m) == 0
    den = jnp.sum(wgt * s)
    num_y = jnp.sum(wgt * ny)
    num_x = jnp.sum(wgt * nx)
    return jnp.stack([num_y, num_x]) / den


if __name__ == "__main__":
    key = jax.random.PRNGKey(0)

    def ref_softargmin(x, beta=5.0):
        xb = x.astype(jnp.float32)
        bx_sm = jax.nn.softmax(beta * (-xb).reshape(1, -1), axis=1)
        cf = generate_2dgrid(x.shape[2], x.shape[3], False).reshape(2, -1)
        return (bx_sm * cf).sum(axis=1) / bx_sm.sum(axis=1)

    k1, k2, k3, k4 = jax.random.split(key, 4)

    # Case 1: typical small cost map -> two 8-row tiles, one per "core" lane.
    x_small = jax.random.normal(k1, (1, 1, 16, 16), dtype=jnp.float32)
    out_small = soft_arg_min(x_small, beta=5)
    jax.block_until_ready(out_small)
    ref_small = ref_softargmin(x_small, 5.0)
    assert jnp.allclose(out_small, ref_small, atol=1e-4), (out_small, ref_small)

    # Case 2: larger map forcing multiple tiles per core (online rescale path).
    x_big = jax.random.normal(k2, (1, 1, 32, 256), dtype=jnp.float32)
    out_big = soft_arg_min(x_big, beta=5, tile_rows=8)
    jax.block_until_ready(out_big)
    ref_big = ref_softargmin(x_big, 5.0)
    assert jnp.allclose(out_big, ref_big, atol=1e-3, rtol=1e-5), (out_big, ref_big)

    # Case 3: height not divisible by the tile -> cdiv grid + tail masking.
    x_ragged = jax.random.normal(k3, (1, 1, 37, 160), dtype=jnp.float32)
    out_ragged = soft_arg_min(x_ragged, beta=5)
    jax.block_until_ready(out_ragged)
    ref_ragged = ref_softargmin(x_ragged, 5.0)
    assert jnp.allclose(out_ragged, ref_ragged, atol=1e-3, rtol=1e-5), (out_ragged, ref_ragged)

    # Case 4: bf16 input -> 16-row packed-sublane tiles, in-kernel upcast.
    x_bf16 = jax.random.normal(k4, (1, 1, 32, 128), dtype=jnp.float32).astype(jnp.bfloat16)
    out_bf16 = soft_arg_min(x_bf16, beta=5)
    jax.block_until_ready(out_bf16)
    ref_bf16 = ref_softargmin(x_bf16, 5.0)
    assert jnp.allclose(out_bf16, ref_bf16, atol=1e-2), (out_bf16, ref_bf16)

    print("KERNEL_OK")
</pallas_src>

<mosaic_0001>
module attributes {stable_mosaic.version = 11 : i64} {
  func.func @_softargmin_kernel(%arg0: i32, %arg1: i32, %arg2: memref<8x16xf32, #tpu.memory_space<vmem>>, %arg3: memref<1x1x128xf32, #tpu.memory_space<vmem>>, %arg4: memref<1x1xf32, #tpu.memory_space<vmem>>, %arg5: memref<1x128xf32, #tpu.memory_space<vmem>>) attributes {dimension_semantics = [#tpu.dimension_semantics<parallel>, #tpu.dimension_semantics<arbitrary>], iteration_bounds = array<i64: 2, 1>, scalar_prefetch = 0 : i64, scratch_operands = 2 : i64, tpu.core_type = #tpu.core_type<tc>, window_params = [{transform_indices = @transform_0, window_bounds = array<i64: 8, 16>}, {transform_indices = @transform_1, window_bounds = array<i64: 1, 1, 128>}]} {
    %c0_i32 = arith.constant 0 : i32
    %0 = arith.cmpi eq, %arg1, %c0_i32 : i32
    %1 = arith.extui %0 : i1 to i32
    %c0_i32_0 = arith.constant 0 : i32
    %2 = arith.cmpi ne, %1, %c0_i32_0 : i32
    scf.if %2 {
      %cst_25 = arith.constant -3.000000e+38 : f32
      %82 = vector.broadcast %cst_25 : f32 to vector<1x1xf32>
      %c0_26 = arith.constant 0 : index
      %c0_27 = arith.constant 0 : index
      %83 = vector.load %arg4[%c0_26, %c0_27] : memref<1x1xf32, #tpu.memory_space<vmem>>, vector<1x1xf32>
      tpu.vector_store %arg4[%c0_26, %c0_27], %82 {strides = array<i32>} : memref<1x1xf32, #tpu.memory_space<vmem>>, vector<1x1xf32>,
      %cst_28 = arith.constant 0.000000e+00 : f32
      %84 = vector.broadcast %cst_28 : f32 to vector<1x128xf32>
      %c0_29 = arith.constant 0 : index
      %c0_30 = arith.constant 0 : index
      %85 = vector.load %arg5[%c0_29, %c0_30] : memref<1x128xf32, #tpu.memory_space<vmem>>, vector<1x128xf32>
      tpu.vector_store %arg5[%c0_29, %c0_30], %84 {strides = array<i32>} : memref<1x128xf32, #tpu.memory_space<vmem>>, vector<1x128xf32>,
    } else {
    }
    %c1_i32 = arith.constant 1 : i32
    %3 = arith.muli %arg0, %c1_i32 : i32
    %4 = arith.addi %3, %arg1 : i32
    %c8_i32 = arith.constant 8 : i32
    %5 = arith.muli %4, %c8_i32 : i32
    %c0 = arith.constant 0 : index
    %c0_1 = arith.constant 0 : index
    %6 = vector.load %arg2[%c0, %c0_1] : memref<8x16xf32, #tpu.memory_space<vmem>>, vector<8x16xf32>
    %cst = arith.constant -5.000000e+00 : f32
    %7 = vector.broadcast %cst : f32 to vector<8x16xf32>
    %8 = arith.mulf %7, %6 : vector<8x16xf32>
    %9 = tpu.iota {dimensions = array<i32: 0>} : vector<8x1xi32>
    %10 = vector.broadcast %5 : i32 to vector<8x1xi32>
    %11 = arith.addi %9, %10 : vector<8x1xi32>
    %c16_i32 = arith.constant 16 : i32
    %12 = vector.broadcast %c16_i32 : i32 to vector<8x1xi32>
    %13 = arith.cmpi slt, %11, %12 : vector<8x1xi32>
    %14 = arith.sitofp %11 : vector<8x1xi32> to vector<8x1xf32>
    %cst_2 = arith.constant dense<0xFF800000> : vector<8xf32>
    %15 = vector.multi_reduction <maximumf>, %8, %cst_2 [1] : vector<8x16xf32> to vector<8xf32>
    %16 = vector.shape_cast %15 : vector<8xf32> to vector<8x1xf32>
    %cst_3 = arith.constant -3.000000e+38 : f32
    %17 = vector.broadcast %cst_3 : f32 to vector<8x1xf32>
    %18 = arith.select %13, %16, %17 : vector<8x1xi1>, vector<8x1xf32>
    %c0_4 = arith.constant 0 : index
    %c0_5 = arith.constant 0 : index
    %19 = vector.load %arg4[%c0_4, %c0_5] : memref<1x1xf32, #tpu.memory_space<vmem>>, vector<1x1xf32>
    %20 = vector.shape_cast %18 : vector<8x1xf32> to vector<1x8x1xf32>
    %cst_6 = arith.constant dense<0xFF800000> : vector<1xf32>
    %21 = vector.multi_reduction <maximumf>, %20, %cst_6 [1, 2] : vector<1x8x1xf32> to vector<1xf32>
    %22 = vector.shape_cast %21 : vector<1xf32> to vector<1x1x1xf32>
    %23 = vector.extract %22[0, 0, 0] : f32 from vector<1x1x1xf32>
    %24 = vector.broadcast %23 : f32 to vector<1x1xf32>
    %25 = arith.maximumf %19, %24 : vector<1x1xf32>
    %26 = arith.subf %19, %25 : vector<1x1xf32>
    %27 = math.exp %26 : vector<1x1xf32>
    %28 = vector.broadcast %25 : vector<1x1xf32> to vector<8x16xf32>
    %29 = arith.subf %8, %28 : vector<8x16xf32>
    %30 = math.exp %29 : vector<8x16xf32>
    %cst_7 = arith.constant 0.000000e+00 : f32
    %31 = vector.shape_cast %13 : vector<8x1xi1> to vector<8x1xi1>
    %32 = vector.broadcast %31 : vector<8x1xi1> to vector<8x16xi1>
    %33 = vector.broadcast %cst_7 : f32 to vector<8x16xf32>
    %34 = arith.select %32, %30, %33 : vector<8x16xi1>, vector<8x16xf32>
    %cst_8 = arith.constant dense<0.000000e+00> : vector<8xf32>
    %35 = vector.multi_reduction <add>, %34, %cst_8 [1] : vector<8x16xf32> to vector<8xf32>
    %36 = vector.shape_cast %35 : vector<8xf32> to vector<8x1xf32>
    %cst_9 = arith.constant dense<0.000000e+00> : vector<16xf32>
    %37 = vector.multi_reduction <add>, %34, %cst_9 [0] : vector<8x16xf32> to vector<16xf32>
    %38 = vector.shape_cast %37 : vector<16xf32> to vector<1x16xf32>
    %39 = tpu.iota {dimensions = array<i32: 1>} : vector<1x16xi32>
    %40 = arith.sitofp %39 : vector<1x16xi32> to vector<1x16xf32>
    %41 = vector.shape_cast %36 : vector<8x1xf32> to vector<1x8x1xf32>
    %cst_10 = arith.constant dense<0.000000e+00> : vector<1xf32>
    %42 = vector.multi_reduction <add>, %41, %cst_10 [1, 2] : vector<1x8x1xf32> to vector<1xf32>
    %43 = vector.shape_cast %42 : vector<1xf32> to vector<1x1x1xf32>
    %44 = vector.extract %43[0, 0, 0] : f32 from vector<1x1x1xf32>
    %45 = arith.mulf %36, %14 : vector<8x1xf32>
    %46 = vector.shape_cast %45 : vector<8x1xf32> to vector<1x8x1xf32>
    %cst_11 = arith.constant dense<0.000000e+00> : vector<1xf32>
    %47 = vector.multi_reduction <add>, %46, %cst_11 [1, 2] : vector<1x8x1xf32> to vector<1xf32>
    %48 = vector.shape_cast %47 : vector<1xf32> to vector<1x1x1xf32>
    %49 = vector.extract %48[0, 0, 0] : f32 from vector<1x1x1xf32>
    %50 = arith.mulf %38, %40 : vector<1x16xf32>
    %51 = vector.shape_cast %50 : vector<1x16xf32> to vector<1x1x16xf32>
    %cst_12 = arith.constant dense<0.000000e+00> : vector<1xf32>
    %52 = vector.multi_reduction <add>, %51, %cst_12 [1, 2] : vector<1x1x16xf32> to vector<1xf32>
    %53 = vector.shape_cast %52 : vector<1xf32> to vector<1x1x1xf32>
    %54 = vector.extract %53[0, 0, 0] : f32 from vector<1x1x1xf32>
    %55 = tpu.iota {dimensions = array<i32: 1>} : vector<1x128xi32>
    %c1_i32_13 = arith.constant 1 : i32
    %56 = vector.broadcast %c1_i32_13 : i32 to vector<1x128xi32>
    %57 = arith.cmpi eq, %55, %56 : vector<1x128xi32>
    %cst_14 = arith.constant 0.000000e+00 : f32
    %58 = vector.broadcast %44 : f32 to vector<1x128xf32>
    %59 = vector.broadcast %cst_14 : f32 to vector<1x128xf32>
    %60 = arith.select %57, %58, %59 : vector<1x128xi1>, vector<1x128xf32>
    %c2_i32 = arith.constant 2 : i32
    %61 = vector.broadcast %c2_i32 : i32 to vector<1x128xi32>
    %62 = arith.cmpi eq, %55, %61 : vector<1x128xi32>
    %cst_15 = arith.constant 0.000000e+00 : f32
    %63 = vector.broadcast %49 : f32 to vector<1x128xf32>
    %64 = vector.broadcast %cst_15 : f32 to vector<1x128xf32>
    %65 = arith.select %62, %63, %64 : vector<1x128xi1>, vector<1x128xf32>
    %66 = arith.addf %60, %65 : vector<1x128xf32>
    %c3_i32 = arith.constant 3 : i32
    %67 = vector.broadcast %c3_i32 : i32 to vector<1x128xi32>
    %68 = arith.cmpi eq, %55, %67 : vector<1x128xi32>
    %cst_16 = arith.constant 0.000000e+00 : f32
    %69 = vector.broadcast %54 : f32 to vector<1x128xf32>
    %70 = vector.broadcast %cst_16 : f32 to vector<1x128xf32>
    %71 = arith.select %68, %69, %70 : vector<1x128xi1>, vector<1x128xf32>
    %72 = arith.addf %66, %71 : vector<1x128xf32>
    %c0_17 = arith.constant 0 : index
    %c0_18 = arith.constant 0 : index
    %73 = vector.load %arg5[%c0_17, %c0_18] : memref<1x128xf32, #tpu.memory_space<vmem>>, vector<1x128xf32>
    %74 = vector.broadcast %27 : vector<1x1xf32> to vector<1x128xf32>
    %75 = arith.mulf %74, %73 : vector<1x128xf32>
    %76 = arith.addf %75, %72 : vector<1x128xf32>
    %c0_19 = arith.constant 0 : index
    %c0_20 = arith.constant 0 : index
    %77 = vector.load %arg5[%c0_19, %c0_20] : memref<1x128xf32, #tpu.memory_space<vmem>>, vector<1x128xf32>
    tpu.vector_store %arg5[%c0_19, %c0_20], %76 {strides = array<i32>} : memref<1x128xf32, #tpu.memory_space<vmem>>, vector<1x128xf32>,
    %c0_21 = arith.constant 0 : index
    %c0_22 = arith.constant 0 : index
    %78 = vector.load %arg4[%c0_21, %c0_22] : memref<1x1xf32, #tpu.memory_space<vmem>>, vector<1x1xf32>
    tpu.vector_store %arg4[%c0_21, %c0_22], %25 {strides = array<i32>} : memref<1x1xf32, #tpu.memory_space<vmem>>, vector<1x1xf32>,
    %c0_i32_23 = arith.constant 0 : i32
    %79 = arith.cmpi eq, %arg1, %c0_i32_23 : i32
    %80 = arith.extui %79 : i1 to i32
    %c0_i32_24 = arith.constant 0 : i32
    %81 = arith.cmpi ne, %80, %c0_i32_24 : i32
    scf.if %81 {
      %c0_i32_25 = arith.constant 0 : i32
      %82 = vector.broadcast %c0_i32_25 : i32 to vector<1x128xi32>
      %83 = arith.cmpi eq, %55, %82 : vector<1x128xi32>
      %c0_26 = arith.constant 0 : index
      %c0_27 = arith.constant 0 : index
      %84 = vector.load %arg4[%c0_26, %c0_27] : memref<1x1xf32, #tpu.memory_space<vmem>>, vector<1x1xf32>
      %c0_28 = arith.constant 0 : index
      %c0_29 = arith.constant 0 : index
      %85 = vector.load %arg5[%c0_28, %c0_29] : memref<1x128xf32, #tpu.memory_space<vmem>>, vector<1x128xf32>
      %86 = vector.shape_cast %84 : vector<1x1xf32> to vector<1x1xf32>
      %87 = vector.broadcast %86 : vector<1x1xf32> to vector<1x128xf32>
      %88 = arith.select %83, %87, %85 : vector<1x128xi1>, vector<1x128xf32>
      %89 = vector.shape_cast %88 : vector<1x128xf32> to vector<1x1x128xf32>
      %c0_30 = arith.constant 0 : index
      %c0_31 = arith.constant 0 : index
      %c0_32 = arith.constant 0 : index
      %90 = vector.load %arg3[%c0_30, %c0_31, %c0_32] : memref<1x1x128xf32, #tpu.memory_space<vmem>>, vector<1x1x128xf32>
      tpu.vector_store %arg3[%c0_30, %c0_31, %c0_32], %89 {strides = array<i32>} : memref<1x1x128xf32, #tpu.memory_space<vmem>>, vector<1x1x128xf32>,
    } else {
    }
    return
  }
  func.func @transform_0(%arg0: i32, %arg1: i32) -> (i32, i32) {
    %c1_i32 = arith.constant 1 : i32
    %0 = arith.muli %arg0, %c1_i32 : i32
    %1 = arith.addi %0, %arg1 : i32
    %c1_i32_0 = arith.constant 1 : i32
    %2 = arith.minsi %1, %c1_i32_0 : i32
    %c0_i32 = arith.constant 0 : i32
    %c0_i32_1 = arith.constant 0 : i32
    return %2, %c0_i32 : i32, i32
  }
  func.func @transform_1(%arg0: i32, %arg1: i32) -> (i32, i32, i32) {
    %c0_i32 = arith.constant 0 : i32
    %c0_i32_0 = arith.constant 0 : i32
    %c0_i32_1 = arith.constant 0 : i32
    return %arg0, %c0_i32, %c0_i32_0 : i32, i32, i32
  }
}

</mosaic_0001>

<bundles_post_ra>
// kernel: tpu_custom_call.1
= control target key start
LH: loop header
LB: loop body
LE: loop exit
PB: predicated region body
PF: predicated region fallthrough
CT: control target
= control target key end

     0   :  { %6 = vsyncpa [#allocation5], 0  ;;  %s836_s0 = inlined_call_operand.hbm [shape: f32[16,16], index: 0, kind: input, shape index: {}]   ;;  %s837_s1 = inlined_call_operand.hbm [shape: f32[2,1,128], index: 1, kind: output, shape index: {}]  }
   0x1   :  { %8 = vsyncpa [#allocation5 + $0x1], 0 }
   0x2   :  { %9 = vsyncpa [#allocation6], 0 }
   0x3   :  { %11 = vsyncpa [#allocation6 + $0x1], 0  ;;  %s645_s6 = smov 0   ;;  %s647_s7 = smov 0  }
   0x4   :  { %s649_s8 = smov 0   ;;  %s651_s9 = smov 0  }
   0x5   :  { %s653_s10 = smov 0   ;;  %s655_s11 = smov 0  }
   0x6   :  { %s657_s12 = smov 0   ;;  %s659_s13 = smov 0  }
   0x7   :  { %s661_s14 = smov 0  }
   0x8 LB: > { %s381_s15 = sadd.s32 4294967295, %s628_s14   ;;  %s382_s16 = sadd.s32 4294967294, %s628_s14   ;;  %s628_s14 = sphi %s661_s14, %s17_s14   ;;  %s624_s13 = sphi %s659_s13, %s852_s13   ;;  %s620_s12 = sphi %s657_s12, %s851_s12   ;;  %s616_s11 = sphi %s655_s11, %s850_s11   ;;  %s612_s10 = sphi %s653_s10, %s849_s10   ;;  %s608_s9 = sphi %s651_s9, %s848_s9   ;;  %s604_s8 = sphi %s649_s8, %s847_s8   ;;  %s600_s7 = sphi %s647_s7, %s846_s7   ;;  %s596_s6 = sphi %s645_s6, %s845_s6  }
   0x9   : > { %s29_s17 = sadd.s32 1, %s624_s13  ;;  %p34_p0 = scmp.lt.s32.totalorder %s624_s13, 1 }
   0xa   : > { %p31_p1 = scmp.ge.s32.totalorder %s29_s17, 2  ;;  %s42_s18 = sadd.s32 1, %s616_s11 }
   0xb   : > { %s694_s19 = scalar_select %p34_p0, %s624_s13, 1 }
   0xc   : > { %s854_s17 = smov (%p31_p1, %s29_s17), 0  ;;  %p49_p2 = scmp.ne.s32.totalorder %s616_s11, %s612_s10 }
   0xd   : > { %p50_p3 = scmp.eq.s32.totalorder %s628_s14, 0  ;;  %p37_p4 = scmp.lt.s32.totalorder %s854_s17, 1 }
   0xe   : > { %p55_p5 = scmp.ne.s32.totalorder %s612_s10, %s608_s9  ;;  %p56_p7 = scmp.eq.s32.totalorder %s381_s15, 0 }
   0xf   : > { %p703_p6 = por %p50_p3, %p49_p2  ;;  %s65_s23 = ssub.s32 %s624_s13, %s854_s17 }
  0x10   : > { %s38_s21 = scalar_select %p37_p4, %s854_s17, 1 }
  0x11   : > { %p708_p8 = por %p56_p7, %p55_p5  ;;  %p66_p9 = scmp.eq.s32.totalorder %s65_s23, 0 }
  0x12   : > { %s39_s24 = ssub.s32 %s694_s19, %s38_s21  ;;  %s68_s25 = sadd.s32 1, %s604_s8 }
  0x13   : > { %p40_p10 = scmp.eq.s32.totalorder %s39_s24, 0  ;;  %p78_p11 = scmp.ne.s32.totalorder %s604_s8, %s600_s7 }
  0x14   : > { %s717_s26 = scalar_select %p66_p9, %s604_s8, %s68_s25  }
  0x15   : > { %s720_s27 = scalar_select %p40_p10, %s616_s11, %s42_s18  }
  0x16   : > { %p79_p12 = scmp.eq.s32.totalorder %s381_s15, 1  ;;  %p84_p13 = scmp.ne.s32.totalorder %s600_s7, %s596_s6 }
  0x17   : > { %p85_p0 = scmp.eq.s32.totalorder %s382_s16, 1  ;;  %p413_p4 = scmp.lt.s32.totalorder %s628_s14, 2 }
  0x18   : > { %p726_p1 = por %p79_p12, %p78_p11  ;;  %s105_s30 = sand.u32 1, %s616_s11  }
  0x19   : > { %p731_p3 = por %p85_p0, %p84_p13  ;;  %s386_s2 = sshll.u32 %s694_s19, 7 }
  0x1a   : > { %s385_s3 = sshll.u32 %s105_s30, 3  ;;  %s117_s9 = scalar_lea.hbm %s836_s0, %s386_s2 }
  0x1b   : > { %s841_s29 = scalar_select %p731_p3, 1, 0 }
  0x1c   : > { %s109_s15 = scalar_lea.vmem [#allocation4], %s385_s3  ;;  %p743_p5 = pnand %p413_p4, %p703_p6 }
  0x1d   : > { %s119_s18 = sshll.u32 %s109_s15, 4  ;;  %p387_p7 = scmp.ge.s32.totalorder %s628_s14, 1  ;;  %s120_s18 = int_to_ptr.vmem [resolvable:$true] %s119_s18 }
  0x1e   : > { %p124_p9 = scmp.lt.s32.totalorder %s628_s14, 3  ;;  %s106_s21 = scalar_lea.sflag [#allocation5], %s105_s30 }
  0x1f   : > { %p498_p10 = pneg %p743_p5  ;;  %s509_s19 = scalar_lea.vmem %s120_s18, 128 }
  0x20   : > { %p510_p11 = scmp.ne.s32.totalorder %s120_s18, %s509_s19  ;;  %s630_s23 = smov [#allocation4]  }
  0x21   : > { %s514_s24 = sshll.u32 %s630_s23, 4  ;;  %s515_s24 = int_to_ptr.vmem [resolvable:$false] %s514_s24 }
  0x22   : > { %p512_p12 = pnand %p510_p11, %p498_p10  ;;  %s516_s25 = scalar_lea.vmem %s515_s24, 256 }
  0x23   : > { %p517_p0 = scmp.lt.s32.totalorder %s120_s18, %s515_s24  ;;  %p518_p6 = scmp.lt.s32.totalorder %s516_s25, %s509_s19 }
  0x24   : > { %p513_p13 = pneg %p512_p12 }
  0x25   : > { %p519_p4 = por %p518_p6, %p517_p0 }
  0x27   : > { %p520_p2 = pnand %p519_p4, %p513_p13 }
  0x29   : > { %523 = shalt.err (!%p520_p2)
}
  0x2a   : > { %408 = dma.hbm_to_vmem [thread:$0]  (!%p743_p5), %s117_s9, 128, %s120_s18, %s106_s21  }
  0x2b   : > { %p125_p3 = pnand %p387_p7, %p124_p9 }
  0x2c   : > { %s130_s20 = sand.u32 (!%p125_p3), 1, %s612_s10  }
  0x2d   : > { %128 = sbr.rel (%p125_p3) target bundleno = 780 (0x30c), region = 24  ;;  %s388_s30 = sshll.u32 (!%p125_p3), %s130_s20, 3 }
  0x2e   : > { %s131_s2 = scalar_lea.sflag (!%p125_p3), [#allocation5], %s130_s20  ;;  %s134_s3 = scalar_lea.vmem (!%p125_p3), [#allocation4], %s388_s30 }
  0x32   : > { %587 = dma.done.wait (%p708_p8), %s131_s2, 128  }
  0x33   : > { %589 = vsyncadd (%p708_p8), %s131_s2, 4294967168  ;;  %v631_v0 = vmov 0.0   ;;  %v164_v1 = vld [vmem:[%s134_s3] sm:$0xff]  ;;  %vm172_vm0 = vcmask 130048   ;;  %vm159_vm1 = vcmask 0   ;;  %v633_v5 = vmov 0  }
  0x34   : > { %161 = vst [vmem:[#allocation3] sm:$0x1] %v631_v0  ;;  %v165_v2 = vmul.f32 -5.0, %v164_v1  ;;  %v632_v4 = vmov -3e+38   ;;  %490 = vset.pattern.permute.xlu0 %v633_v5  ;;  %491 = vset.pattern.permute.xlu1 %v633_v5  ;;  %v166_v6 = vlaneseq  ;;  %s389_s4 = sshll.u32 %s620_s12, 3 }
  0x35   : > { %160 = vst.msk [vmem:[#allocation2] sm:$0x1] %vm159_vm1, %v632_v4  ;;  %v168_v8 = vstv %s389_s4  ;;  %vm217_vm3 = vcmask 7168   ;;  %vm240_vm4 = vcmask 122880   ;;  %s150_s18 = sand.u32 1, %s600_s7   ;;  %s390_s16 = sshll.u32 %s620_s12, 4 }
  0x36   : > { %v173_v3 = vsel %vm172_vm0, %v165_v2, -inf  ;;  %v167_v7 = vshrl.u32 %v166_v6, 7  ;;  %v772_v34 = vand.u32 127, %v166_v6  ;;  %s151_s21 = scalar_lea.vmem [#allocation7], %s150_s18  ;;  %s786_s25 = scalar_lea.hbm %s837_s1, %s390_s16 }
  0x37   : > { %174 = vmax.xlane.f32.xlu0 %v173_v3  ;;  %s307_s19 = sshll.u32 %s151_s21, 4  ;;  %s295_s20 = scalar_lea.sflag [#allocation6], %s150_s18  ;;  %s308_s19 = int_to_ptr.vmem [resolvable:$true] %s307_s19 }
  0x38   : > { %v169_v9 = vadd.s32 %v168_v8, %v167_v7  ;;  %v766_v19 = vsub.s32 0, %v167_v7  ;;  %v216_v41 = vcvt.s32.f32 %v772_v34  ;;  %vm254_vm5 = vcmp.eq.s32.totalorder %v772_v34, 2  ;;  %s524_s30 = scalar_lea.vmem %s308_s19, 16  ;;  %s634_s12 = smov [#allocation7]  }
  0x39   : > { %vm251_vm6 = vcmp.eq.s32.totalorder %v772_v34, 1  ;;  %vm258_vm7 = vcmp.eq.s32.totalorder %v772_v34, 3  ;;  %vm280_vm8 = vcmp.eq.s32.totalorder %v772_v34, 0  ;;  %p525_p8 = scmp.ne.s32.totalorder %s308_s19, %s524_s30  ;;  %s528_s2 = sshll.u32 %s634_s12, 4  ;;  %s529_s2 = int_to_ptr.vmem [resolvable:$false] %s528_s2 }
  0x3a   : > { %vm170_vm2 = vcmp.lt.s32.totalorder %v169_v9, 16  ;;  %v171_v35 = vcvt.s32.f32 %v169_v9  ;;  %s530_s3 = scalar_lea.vmem %s529_s2, 32  ;;  %p531_p5 = scmp.lt.s32.totalorder %s308_s19, %s529_s2 }
  0x3b   : > { %p526_p2 = pnand %p525_p8, %p726_p1  ;;  %p532_p7 = scmp.lt.s32.totalorder %s530_s3, %s524_s30 }
  0x3c   : > { %v177_v18 = vld [vmem:[#allocation2] sm:$0x1] }
  0x3d   : > { %p527_p3 = pneg %p526_p2  ;;  %p533_p9 = por %p532_p7, %p531_p5 }
  0x3f   : > { %p534_p10 = pnand %p533_p9, %p527_p3 }
  0xc0   : > { %v175_v10 = vpop.xlane.xlu0 %174 }
  0xc1   : > { %v176_v11 = vsel %vm170_vm2, %v175_v10, -3e+38  ;;  %v262_v10 = vld [vmem:[#allocation3] sm:$0x1] }
  0xc2   : > { %v178_v12 = vrot.slane %v176_v11, 4 }
  0xc4   : > { %v179_v13 = vmax.f32 %v176_v11, %v178_v12 }
  0xc6   : > { %v180_v14 = vrot.slane %v179_v13, 2 }
  0xc8   : > { %v181_v15 = vmax.f32 %v179_v13, %v180_v14 }
  0xca   : > { %v182_v16 = vrot.slane %v181_v15, 1 }
  0xcc   : > { %v183_v17 = vmax.f32 %v181_v15, %v182_v16 }
  0xce   : > { %393 = vpush %v183_v17 }
  0xff   : > { %s394_s22 = spop %393 }
 0x100   : > { %v185_v20 = vstv %s394_s22 }
 0x101   : > { %v186_v21 = vmax.f32 %v177_v18, %v185_v20 }
 0x103   : > { %v187_v22 = vsub.f32 %v177_v18, %v186_v21  ;;  %276 = vst.msk [vmem:[#allocation2] sm:$0x1] %vm159_vm1, %v186_v21  ;;  %v194_v23 = vrot.slane %v186_v21, %v766_v19 }
 0x105   : > { %196 = vperm.xlu0 %490, %v194_v23   ;;  %v188_v44 = vmul.f32 1.442695, %v187_v22 }
 0x10a   : > { %v281_v47 = vld [vmem:[#allocation2] sm:$0x1] }
 0x180   : > { %v197_v24 = vpop.permute.xlu0 %196 }
 0x181   : > { %v199_v25 = vsub.f32 %v165_v2, %v197_v24 }
 0x183   : > { %v200_v26 = vmul.f32 1.442695, %v199_v25 }
 0x185   : > { %492 = vpow2.f32 %v200_v26 }
 0x186   : > { %494 = vpow2.f32 %v188_v44 }
 0x192   : > { %v493_v27 = vpop.eup %492 }
 0x193   : > { %v204_v28 = vsel %vm170_vm2, %v493_v27, 0.0  ;;  %v495_v46 = vpop.eup %494 }
 0x194   : > { %v205_v29 = vsel %vm172_vm0, %v204_v28, 0.0 }
 0x195   : > { %206 = vadd.xlane.f32.xlu1 %v205_v29  ;;  %v208_v30 = vrot.slane %v205_v29, 4 }
 0x197   : > { %v209_v31 = vadd.f32 %v208_v30, %v205_v29 }
 0x199   : > { %v210_v32 = vrot.slane %v209_v31, 2 }
 0x19b   : > { %v211_v33 = vadd.f32 %v210_v32, %v209_v31 }
 0x19d   : > { %v212_v36 = vrot.slane %v211_v33, 1 }
 0x19f   : > { %v213_v40 = vadd.f32 %v212_v36, %v211_v33 }
 0x1a1   : > { %v239_v43 = vmul.f32 %v216_v41, %v213_v40 }
 0x1a3   : > { %v241_v45 = vsel %vm240_vm4, %v239_v43, 0.0 }
 0x21e   : > { %v207_v37 = vpop.xlane.xlu1 %206 }
 0x21f   : > { %v228_v38 = vmul.f32 %v207_v37, %v171_v35  ;;  %v218_v39 = vsel %vm217_vm3, %v207_v37, 0.0 }
 0x220   : > { %219 = vadd.xlane.f32.xlu1 %v218_v39 }
 0x221   : > { %v229_v42 = vsel %vm217_vm3, %v228_v38, 0.0 }
 0x224   : > { %230 = vadd.xlane.f32.xlu1 %v229_v42 }
 0x228   : > { %242 = vadd.xlane.f32.xlu1 %v241_v45 }
 0x239   : > { %265 = vperm.xlu1 %491, %v495_v46  }
 0x23d   : > { %285 = vperm.xlu1 %491, %v281_v47  }
 0x2a9   : > { %v220_v48 = vpop.xlane.xlu1 %219 }
 0x2aa   : > { %v221_v49 = vrot.slane %v220_v48, 4 }
 0x2ac   : > { %v222_v50 = vadd.f32 %v221_v49, %v220_v48 }
 0x2ad   : > { %v231_v51 = vpop.xlane.xlu1 %230 }
 0x2ae   : > { %v223_v52 = vrot.slane %v222_v50, 2  ;;  %v232_v53 = vrot.slane %v231_v51, 4 }
 0x2b0   : > { %v233_v54 = vadd.f32 %v232_v53, %v231_v51  ;;  %v224_v55 = vadd.f32 %v223_v52, %v222_v50 }
 0x2b1   : > { %v243_v56 = vpop.xlane.xlu1 %242 }
 0x2b2   : > { %v234_v57 = vrot.slane %v233_v54, 2  ;;  %v244_v58 = vrot.slane %v243_v56, 4  ;;  %v225_v59 = vrot.slane %v224_v55, 1 }
 0x2b4   : > { %v245_v60 = vadd.f32 %v244_v58, %v243_v56  ;;  %v226_v61 = vadd.f32 %v225_v59, %v224_v55  ;;  %v235_v62 = vadd.f32 %v234_v57, %v233_v54 }
 0x2b5   : > { %v266_v5 = vpop.permute.xlu1 %265 }
 0x2b6   : > { %v246_v63 = vrot.slane %v245_v60, 2  ;;  %395 = vpush %v226_v61  ;;  %v236_v0 = vrot.slane %v235_v62, 1  ;;  %v271_v9 = vrot.slane %v266_v5, %v766_v19 }
 0x2b8   : > { %v237_v1 = vadd.f32 %v236_v0, %v235_v62  ;;  %v247_v2 = vadd.f32 %v246_v63, %v245_v60  ;;  %v272_v15 = vmul.f32 %v271_v9, %v262_v10 }
 0x2b9   : > { %v286_v18 = vpop.permute.xlu1 %285 }
 0x2ba   : > { %397 = vpush %v237_v1  ;;  %v248_v3 = vrot.slane %v247_v2, 1  ;;  %v291_v20 = vrot.slane %v286_v18, %v766_v19 }
 0x2bc   : > { %v249_v4 = vadd.f32 %v248_v3, %v247_v2 }
 0x2be   : > { %399 = vpush %v249_v4 }
 0x2e7   : > { %s396_s5 = spop %395 }
 0x2e8   : > { %v252_v6 = vstv %s396_s5 }
 0x2e9   : > { %v253_v11 = vsel %vm251_vm6, %v252_v6, 0.0 }
 0x2eb   : > { %s398_s9 = spop %397 }
 0x2ec   : > { %v255_v7 = vstv %s398_s9 }
 0x2ed   : > { %v256_v8 = vsel %vm254_vm5, %v255_v7, 0.0 }
 0x2ee   : > { %v257_v12 = vadd.f32 %v256_v8, %v253_v11 }
 0x2ef   : > { %s400_s15 = spop %399 }
 0x2f0   : > { %v259_v13 = vstv %s400_s15 }
 0x2f1   : > { %v260_v14 = vsel %vm258_vm7, %v259_v13, 0.0 }
 0x2f2   : > { %v261_v16 = vadd.f32 %v260_v14, %v257_v12 }
 0x2f4   : > { %v273_v17 = vadd.f32 %v272_v15, %v261_v16 }
 0x2f6   : > { %274 = vst [vmem:[#allocation3] sm:$0x1] %v273_v17 }
 0x2fd   : > { %v282_v21 = vld [vmem:[#allocation3] sm:$0x1] }
 0x2fe   : > { %v292_v22 = vsel %vm280_vm8, %v291_v20, %v282_v21 }
 0x2ff   : > { %293 = vst [vmem:[%s151_s21] sm:$0x1] %v292_v22 }
 0x300   : > { %537 = shalt.err (!%p534_p10)
}
 0x301   : > { %s538_s4 = scalar_lea.hbm %s786_s25, 16  ;;  %s542_s9 = scalar_lea.hbm %s837_s1, 32 }
 0x302   : > { %p539_p11 = scmp.ne.s32.totalorder %s786_s25, %s538_s4  ;;  %p543_p0 = scmp.lt.s32.totalorder %s786_s25, %s837_s1 }
 0x303   : > { %p544_p6 = scmp.lt.s32.totalorder %s542_s9, %s538_s4 }
 0x304   : > { %p540_p12 = pnand %p539_p11, %p726_p1 }
 0x305   : > { %p545_p4 = por %p544_p6, %p543_p0 }
 0x306   : > { %p541_p13 = pneg %p540_p12 }
 0x308   : > { %p546_p8 = pnand %p545_p4, %p541_p13 }
 0x30a   : > { %549 = shalt.err (!%p546_p8)
}
 0x30b   : > { %403 = dma.vmem_to_hbm [thread:$0]  (%p726_p1), %s308_s19, 16, %s786_s25, %s295_s20  }
 0x30c PF: > { %s319_s16 = sand.u32 1, %s596_s6   ;;  %p843_p2 = scmp.ne.s32.totalorder %s841_s29, 0 }
 0x30d   : > { %p844_p3 = scmp.ge.s32.totalorder %s628_s14, 2  ;;  %s320_s21 = scalar_lea.sflag [#allocation6], %s319_s16 }
 0x30f   : > { %p410_p5 = pnand %p844_p3, %p843_p2 }
 0x311   : > { %p411_p7 = pneg %p410_p5 }
 0x313   : > { %591 = dma.done.wait (%p411_p7), %s320_s21, 16  }
 0x314   : > { %593 = vsyncadd (%p411_p7), %s320_s21, 4294967280  ;;  %s17_s14 = sadd.s32 1, %s628_s14   ;;  %s845_s6 = smov %s600_s7 }
 0x315   : > { %p14_p9 = scmp.ge.s32.totalorder %s17_s14, 4   ;;  %s846_s7 = smov %s604_s8 }
 0x316   : > { %s847_s8 = smov %s717_s26  ;;  %s848_s9 = smov %s612_s10 }
 0x317   : > { %s849_s10 = smov %s616_s11  ;;  %s850_s11 = smov %s720_s27 }
 0x318   : > { %s851_s12 = smov %s624_s13  ;;  %s852_s13 = smov %s854_s17 }
 0x319   :  { %16 = sbr.rel (!%p14_p9) target bundleno = 8 (0x8), region = 77 }
 0x31e   :  { %324 = vsyncpa [#allocation5], 1 }
 0x31f   :  { %326 = vsyncpa [#allocation5 + $0x1], 1 }
 0x320   :  { %327 = vsyncpa [#allocation6], 1 }
 0x321   :  { %329 = vsyncpa [#allocation6 + $0x1], 1 }

</bundles_post_ra>
